<compile_context>
chip_gen: v6e
topology: v6e:2x2x1
jax: 0.10.0
libtpu: 0.0.40
codegen_flags: <defaults>
</compile_context>

<pallas_src>
import jax
import jax.numpy as jnp
from jax.experimental import pallas as pl
from jax.experimental.pallas import tpu as pltpu

# ----------------------------- config (opt.*) -----------------------------
WORD_SIZE = 128          # opt.word_size (baseWord=True); keeps the vocab lane-aligned
EMB_DIM = 8              # opt.embedding_dim
TEXT_DIM = 8             # opt.text_dim
KERNEL_SIZES = (2, 3)    # opt.kernel_sizes (packing below assumes exactly 2 sizes)
KMAX = max(KERNEL_SIZES)
MAX_LEN = 16             # opt.max_len
LINEAR_HIDDEN = 32       # opt.linear_hidden_size
NUM_CLASSES = 4          # opt.num_classes
BATCH = 2
BN_EPS = 1e-5

NUM_BRANCH = len(KERNEL_SIZES)
FEAT_DIM = NUM_BRANCH * 2 * TEXT_DIM      # fc in_features = 32
CONV_OUT = NUM_BRANCH * TEXT_DIM          # both branches' channels side by side = 16
NB = 2 * BATCH                            # both texts stacked along "batch" = 4
R = NB * MAX_LEN                          # flat window rows = 64

# packed bf16 weight buffer layout (all row offsets are multiples of 8)
_EW_ROWS = KMAX * WORD_SIZE               # 384 rows: embedding-folded conv taps
_W1A_OFF = _EW_ROWS                       # 384: w1 rows for text1 features (16 rows)
_W1B_OFF = _EW_ROWS + CONV_OUT            # 400: w1 rows for text2 features (16 rows)
_W2_OFF = _EW_ROWS + FEAT_DIM             # 416: fc2 weight (32 rows)
_WBUF_ROWS = _W2_OFF + LINEAR_HIDDEN      # 448
_WBUF_COLS = max(CONV_OUT, LINEAR_HIDDEN, NUM_CLASSES)   # 32


# ------------------------------ fused Pallas kernel ------------------------------
def fused_cnn_text_kernel(ids_ref, w_ref, s_ref, o_ref):
    B, L, O, V = BATCH, MAX_LEN, TEXT_DIM, WORD_SIZE

    # ---- embedding + conv (both texts, both kernel sizes) as ONE matmul ----------
    # ids_ref rows [j*R, (j+1)*R) hold the flat token ids shifted by tap j.  One
    # compare builds all one-hot slabs; they are placed side by side at 128-aligned
    # lane offsets (no masked selects), then a single (R, KMAX*V) @ (KMAX*V, 2O)
    # bf16 matmul produces BN-scaled conv outputs for every window.
    viota = jax.lax.broadcasted_iota(jnp.int32, (KMAX * R, V), 1)
    oh = (ids_ref[...] == viota).astype(jnp.bfloat16)                  # (3R, V)
    mh = jnp.concatenate([oh[j * R:(j + 1) * R] for j in range(KMAX)],
                         axis=1)                                       # (R, 3V)
    ew = w_ref[0:_EW_ROWS, 0:CONV_OUT]                                 # (384, 16) bf16
    z = jnp.dot(mh, ew, preferred_element_type=jnp.float32)            # (R, 16) f32

    # ---- mask invalid / wrapped windows, max-pool per (text, batch) element ------
    ri = jax.lax.broadcasted_iota(jnp.int32, (R, CONV_OUT), 0)
    ci = jax.lax.broadcasted_iota(jnp.int32, (R, CONV_OUT), 1)
    pos = ri % L                                                       # window position
    limit = jnp.where(ci < O, L - KERNEL_SIZES[0], L - KERNEL_SIZES[1])
    z = jnp.where(pos <= limit, z, -jnp.inf)
    pooled = jnp.max(z.reshape(NB, L, CONV_OUT), axis=1)               # (NB, 16)

    # conv bias + eval BN: scale already folded into `ew`; shift added after the pool
    conv_shift = s_ref[0:1, 0:CONV_OUT]                                # (1, 16) f32
    feats = jnp.maximum(pooled + conv_shift, 0.0).astype(jnp.bfloat16)  # (NB, 16)

    # ---- Dropout: eval-mode identity ---------------------------------------------
    # TODO(synk): training-mode dropout would use pltpu.prng_seed/prng_random_bits.

    # ---- fc1: concat-free, accumulate against static row-slices of w1 ------------
    # torch feature order per row b: [text1 k2 | text1 k3 | text2 k2 | text2 k3]
    #                              = [feats[b] (16 lanes) | feats[B+b] (16 lanes)]
    w1a = w_ref[_W1A_OFF:_W1B_OFF, 0:LINEAR_HIDDEN]                    # (16, 32) bf16
    w1b = w_ref[_W1B_OFF:_W2_OFF, 0:LINEAR_HIDDEN]                     # (16, 32) bf16
    h = (jnp.dot(feats[0:B], w1a, preferred_element_type=jnp.float32) +
         jnp.dot(feats[B:NB], w1b, preferred_element_type=jnp.float32))
    fc_shift = s_ref[1:2, 0:LINEAR_HIDDEN]                             # (1, 32) f32
    h = jnp.maximum(h + fc_shift, 0.0).astype(jnp.bfloat16)            # (B, 32)

    # ---- fc2 ----------------------------------------------------------------------
    # (B, NUM_CLASSES) store is lane-sparse/masked; negligible here (v5e note).
    w2 = w_ref[_W2_OFF:_WBUF_ROWS, 0:NUM_CLASSES]                      # (32, 4) bf16
    b2 = s_ref[2:3, 0:NUM_CLASSES]                                     # (1, 4) f32
    o_ref[...] = jnp.dot(h, w2, preferred_element_type=jnp.float32) + b2


# ------------------------------ pallas_call wrapper ------------------------------
def _full_spec(shape):
    n = len(shape)
    return pl.BlockSpec(shape, lambda i, _n=n: (0,) * _n)


def _cost_estimate(inputs):
    flops = 2 * R * (KMAX * WORD_SIZE) * CONV_OUT          # fused embed+conv matmul
    flops += 2 * 2 * BATCH * CONV_OUT * LINEAR_HIDDEN      # fc1 (two row-block dots)
    flops += 2 * BATCH * LINEAR_HIDDEN * NUM_CLASSES       # fc2
    in_bytes = sum(int(x.size) * x.dtype.itemsize for x in inputs)
    out_bytes = BATCH * NUM_CLASSES * 4
    return pl.CostEstimate(flops=flops, transcendentals=0,
                           bytes_accessed=in_bytes + out_bytes)


@jax.jit
def cnn_text_forward(params, text1, text2):
    B, L = text1.shape
    assert (B, L) == (BATCH, MAX_LEN)
    # Stack both texts, then build the tap-shifted id column (rows [j*R, (j+1)*R) are
    # the flat ids rolled by j).  Wrapped / cross-element windows are masked in-kernel.
    flat = jnp.concatenate([text1, text2], axis=0).astype(jnp.int32).reshape(2 * B * L)
    ids_tap = jnp.concatenate([jnp.roll(flat, -j) for j in range(KMAX)], axis=0)
    ids_tap = ids_tap.reshape(KMAX * 2 * B * L, 1)

    inputs = (ids_tap, params["wbuf"], params["sbuf"])
    return pl.pallas_call(
        fused_cnn_text_kernel,
        out_shape=jax.ShapeDtypeStruct((B, NUM_CLASSES), jnp.float32),
        grid=(1,),
        in_specs=[_full_spec(x.shape) for x in inputs],
        out_specs=_full_spec((B, NUM_CLASSES)),
        compiler_params=pltpu.CompilerParams(dimension_semantics=("arbitrary",)),
        cost_estimate=_cost_estimate(inputs),
    )(*inputs)


# ------------------------------ parameter setup --------------------------------
def init_params(key):
    keys = jax.random.split(key, 8)
    params = {}
    emb = 0.1 * jax.random.normal(keys[0], (WORD_SIZE, EMB_DIM), jnp.float32)
    params["emb"] = emb

    convs = []
    for i, K in enumerate(KERNEL_SIZES):
        kk = jax.random.split(keys[1 + i], 6)
        w = 0.1 * jax.random.normal(kk[0], (TEXT_DIM, EMB_DIM, K), jnp.float32)  # torch (O,C,K)
        b = 0.1 * jax.random.normal(kk[1], (TEXT_DIM,), jnp.float32)
        gamma = 1.0 + 0.1 * jax.random.normal(kk[2], (TEXT_DIM,), jnp.float32)
        beta = 0.1 * jax.random.normal(kk[3], (TEXT_DIM,), jnp.float32)
        mean = 0.1 * jax.random.normal(kk[4], (TEXT_DIM,), jnp.float32)
        var = 1.0 + jnp.abs(jax.random.normal(kk[5], (TEXT_DIM,), jnp.float32))
        s = gamma / jnp.sqrt(var + BN_EPS)                 # fold conv bias + eval BN
        shift = s * (b - mean) + beta
        convs.append(dict(w=w, b=b, gamma=gamma, beta=beta, mean=mean, var=var,
                          s=s, shift=shift, K=K))
    params["convs"] = convs

    kf = jax.random.split(keys[3], 8)
    w1 = 0.1 * jax.random.normal(kf[0], (LINEAR_HIDDEN, FEAT_DIM), jnp.float32)   # torch (H,F)
    b1 = 0.1 * jax.random.normal(kf[1], (LINEAR_HIDDEN,), jnp.float32)
    gamma1 = 1.0 + 0.1 * jax.random.normal(kf[2], (LINEAR_HIDDEN,), jnp.float32)
    beta1 = 0.1 * jax.random.normal(kf[3], (LINEAR_HIDDEN,), jnp.float32)
    mean1 = 0.1 * jax.random.normal(kf[4], (LINEAR_HIDDEN,), jnp.float32)
    var1 = 1.0 + jnp.abs(jax.random.normal(kf[5], (LINEAR_HIDDEN,), jnp.float32))
    w2 = 0.1 * jax.random.normal(kf[6], (NUM_CLASSES, LINEAR_HIDDEN), jnp.float32)  # torch (C,H)
    b2 = 0.1 * jax.random.normal(kf[7], (NUM_CLASSES,), jnp.float32)
    s1 = gamma1 / jnp.sqrt(var1 + BN_EPS)
    params.update(dict(w1=w1, b1=b1, gamma1=gamma1, beta1=beta1,
                       mean1=mean1, var1=var1, w2=w2, b2=b2))

    # ----- fold + pack for the fused kernel -----
    # Embedding folded into BN-scaled conv-tap weights: EW_j = emb @ (W_tap_j^T * s).
    ew_blocks = []
    for j in range(KMAX):
        cols = []
        for c in convs:
            if j < c["K"]:
                tap = c["w"][:, :, j].T * c["s"][None, :]            # (E, O)
                cols.append(emb @ tap)                               # (V, O)
            else:
                cols.append(jnp.zeros((WORD_SIZE, TEXT_DIM), jnp.float32))
        ew_blocks.append(jnp.concatenate(cols, axis=1))              # (V, 2O)
    ew = jnp.concatenate(ew_blocks, axis=0)                          # (KMAX*V, 2O)

    w1t_scaled = w1.T * s1[None, :]                                  # (F, H), BN scale folded
    w2t = w2.T                                                       # (H, C)

    def pad_cols(a, width=_WBUF_COLS):
        return jnp.pad(a, ((0, 0), (0, width - a.shape[1])))

    def pad_row(v, width=_WBUF_COLS):
        return jnp.pad(v, (0, width - v.shape[0]))

    params["wbuf"] = jnp.concatenate(
        [pad_cols(ew), pad_cols(w1t_scaled), pad_cols(w2t)], axis=0).astype(jnp.bfloat16)

    conv_shift = jnp.concatenate([c["shift"] for c in convs])        # (2O,)
    fc_shift = s1 * (b1 - mean1) + beta1                             # (H,)
    params["sbuf"] = jnp.stack(
        [pad_row(conv_shift), pad_row(fc_shift), pad_row(b2)]).astype(jnp.float32)
    return params


# ----------------------------- pure-JAX reference ------------------------------
def reference_forward(params, text1, text2):
    emb = params["emb"]

    def branch(x, c):
        K = c["w"].shape[2]
        L_out = MAX_LEN - K + 1
        cols = []
        for t in range(L_out):
            cols.append(jnp.einsum("bke,oek->bo", x[:, t:t + K, :], c["w"]))
        z = jnp.stack(cols, axis=2) + c["b"][None, :, None]          # (B, O, L_out)
        s = c["gamma"] / jnp.sqrt(c["var"] + BN_EPS)
        z = s[None, :, None] * (z - c["mean"][None, :, None]) + c["beta"][None, :, None]
        z = jnp.maximum(z, 0.0)
        return jnp.max(z, axis=2)

    x1, x2 = emb[text1], emb[text2]
    feats = jnp.concatenate(
        [branch(x1, c) for c in params["convs"]] +
        [branch(x2, c) for c in params["convs"]], axis=1)
    h = feats @ params["w1"].T + params["b1"]
    s = params["gamma1"] / jnp.sqrt(params["var1"] + BN_EPS)
    h = jnp.maximum(s * (h - params["mean1"]) + params["beta1"], 0.0)
    return h @ params["w2"].T + params["b2"]


# ----------------------------------- main ---------------------------------------
if __name__ == "__main__":
    key = jax.random.PRNGKey(0)
    kp, k1, k2 = jax.random.split(key, 3)
    params = init_params(kp)

    text1 = jax.random.randint(k1, (BATCH, MAX_LEN), 0, WORD_SIZE, dtype=jnp.int32)
    text2 = jax.random.randint(k2, (BATCH, MAX_LEN), 0, WORD_SIZE, dtype=jnp.int32)

    logits = cnn_text_forward(params, text1, text2)
    logits = jax.block_until_ready(logits)

    ref = reference_forward(params, text1, text2)
    assert logits.shape == (BATCH, NUM_CLASSES)
    assert jnp.allclose(logits, ref, atol=1e-2, rtol=1e-2)

    print("KERNEL_OK")
</pallas_src>

<mosaic_0001>
module attributes {stable_mosaic.version = 11 : i64} {
  func.func @fused_cnn_text_kernel(%arg0: i32, %arg1: memref<192x1xi32, #tpu.memory_space<vmem>>, %arg2: memref<448x32xbf16, #tpu.memory_space<vmem>>, %arg3: memref<3x32xf32, #tpu.memory_space<vmem>>, %arg4: memref<2x4xf32, #tpu.memory_space<vmem>>) attributes {dimension_semantics = [#tpu.dimension_semantics<arbitrary>], iteration_bounds = array<i64: 1>, scalar_prefetch = 0 : i64, scratch_operands = 0 : i64, tpu.core_type = #tpu.core_type<tc>, window_params = [{pipeline_mode = #tpu.pipeline_mode<synchronous>, transform_indices = @transform_0, window_bounds = array<i64: 192, 1>}, {pipeline_mode = #tpu.pipeline_mode<synchronous>, transform_indices = @transform_1, window_bounds = array<i64: 448, 32>}, {pipeline_mode = #tpu.pipeline_mode<synchronous>, transform_indices = @transform_2, window_bounds = array<i64: 3, 32>}, {pipeline_mode = #tpu.pipeline_mode<synchronous>, transform_indices = @transform_3, window_bounds = array<i64: 2, 4>}]} {
    %0 = tpu.iota {dimensions = array<i32: 1>} : vector<192x128xi32>
    %c0 = arith.constant 0 : index
    %c0_0 = arith.constant 0 : index
    %1 = vector.load %arg1[%c0, %c0_0] : memref<192x1xi32, #tpu.memory_space<vmem>>, vector<192x1xi32>
    %2 = vector.broadcast %1 : vector<192x1xi32> to vector<192x128xi32>
    %3 = arith.cmpi eq, %2, %0 : vector<192x128xi32>
    %4 = arith.extui %3 : vector<192x128xi1> to vector<192x128xi32>
    %5 = arith.sitofp %4 : vector<192x128xi32> to vector<192x128xf32>
    %6 = arith.truncf %5 : vector<192x128xf32> to vector<192x128xbf16>
    %7 = vector.extract_strided_slice %6 {offsets = [0, 0], sizes = [64, 128], strides = [1, 1]} : vector<192x128xbf16> to vector<64x128xbf16>
    %8 = vector.extract_strided_slice %6 {offsets = [64, 0], sizes = [64, 128], strides = [1, 1]} : vector<192x128xbf16> to vector<64x128xbf16>
    %9 = vector.extract_strided_slice %6 {offsets = [128, 0], sizes = [64, 128], strides = [1, 1]} : vector<192x128xbf16> to vector<64x128xbf16>
    %10 = tpu.concatenate %7, %8, %9 in 1 : vector<64x128xbf16>, vector<64x128xbf16>, vector<64x128xbf16> -> vector<64x384xbf16>
    %c0_1 = arith.constant 0 : index
    %c0_2 = arith.constant 0 : index
    %11 = vector.load %arg2[%c0_1, %c0_2] : memref<448x32xbf16, #tpu.memory_space<vmem>>, vector<384x16xbf16>
    %cst = arith.constant dense<0.000000e+00> : vector<64x16xf32>
    %12 = tpu.matmul %10, %11, %cst {dimension_numbers = #tpu.dot_dimension_numbers<[1], [0], [0], [1], [0, 0, 1, 1], [], []>} : vector<64x384xbf16>, vector<384x16xbf16>, vector<64x16xf32> -> vector<64x16xf32>
    %13 = tpu.iota {dimensions = array<i32: 0>} : vector<64x16xi32>
    %14 = tpu.iota {dimensions = array<i32: 1>} : vector<64x16xi32>
    %c16_i32 = arith.constant 16 : i32
    %c0_i32 = arith.constant 0 : i32
    %15 = arith.cmpi eq, %c16_i32, %c0_i32 : i32
    %c1_i32 = arith.constant 1 : i32
    %16 = arith.select %15, %c1_i32, %c16_i32 : i32
    %17 = vector.broadcast %16 : i32 to vector<64x16xi32>
    %18 = arith.remsi %13, %17 : vector<64x16xi32>
    %c0_i32_3 = arith.constant 0 : i32
    %19 = vector.broadcast %c0_i32_3 : i32 to vector<64x16xi32>
    %20 = arith.cmpi ne, %18, %19 : vector<64x16xi32>
    %c0_i32_4 = arith.constant 0 : i32
    %21 = vector.broadcast %c0_i32_4 : i32 to vector<64x16xi32>
    %22 = arith.cmpi slt, %18, %21 : vector<64x16xi32>
    %c0_i32_5 = arith.constant 0 : i32
    %23 = arith.cmpi slt, %16, %c0_i32_5 : i32
    %24 = vector.broadcast %23 : i1 to vector<64x16xi1>
    %25 = vector.broadcast %24 : vector<64x16xi1> to vector<64x16xi1>
    %26 = arith.xori %22, %25 : vector<64x16xi1>
    %27 = arith.andi %26, %20 : vector<64x16xi1>
    %28 = vector.broadcast %16 : i32 to vector<64x16xi32>
    %29 = arith.addi %18, %28 : vector<64x16xi32>
    %30 = arith.select %27, %29, %18 : vector<64x16xi1>, vector<64x16xi32>
    %c8_i32 = arith.constant 8 : i32
    %31 = vector.broadcast %c8_i32 : i32 to vector<64x16xi32>
    %32 = arith.cmpi slt, %14, %31 : vector<64x16xi32>
    %c14_i32 = arith.constant 14 : i32
    %c13_i32 = arith.constant 13 : i32
    %33 = vector.broadcast %c14_i32 : i32 to vector<64x16xi32>
    %34 = vector.broadcast %c13_i32 : i32 to vector<64x16xi32>
    %35 = arith.select %32, %33, %34 : vector<64x16xi1>, vector<64x16xi32>
    %36 = arith.cmpi sle, %30, %35 : vector<64x16xi32>
    %cst_6 = arith.constant 0xFF800000 : f32
    %37 = vector.broadcast %cst_6 : f32 to vector<64x16xf32>
    %38 = arith.select %36, %12, %37 : vector<64x16xi1>, vector<64x16xf32>
    %39 = vector.shape_cast %38 : vector<64x16xf32> to vector<4x16x16xf32>
    %cst_7 = arith.constant dense<0xFF800000> : vector<4x16xf32>
    %40 = vector.multi_reduction <maximumf>, %39, %cst_7 [1] : vector<4x16x16xf32> to vector<4x16xf32>
    %c0_8 = arith.constant 0 : index
    %c0_9 = arith.constant 0 : index
    %41 = vector.load %arg3[%c0_8, %c0_9] : memref<3x32xf32, #tpu.memory_space<vmem>>, vector<1x16xf32>
    %42 = vector.broadcast %41 : vector<1x16xf32> to vector<4x16xf32>
    %43 = arith.addf %40, %42 : vector<4x16xf32>
    %cst_10 = arith.constant 0.000000e+00 : f32
    %44 = vector.broadcast %cst_10 : f32 to vector<4x16xf32>
    %45 = arith.maximumf %43, %44 : vector<4x16xf32>
    %46 = arith.truncf %45 : vector<4x16xf32> to vector<4x16xbf16>
    %c384 = arith.constant 384 : index
    %c0_11 = arith.constant 0 : index
    %47 = vector.load %arg2[%c384, %c0_11] : memref<448x32xbf16, #tpu.memory_space<vmem>>, vector<16x32xbf16>
    %c400 = arith.constant 400 : index
    %c0_12 = arith.constant 0 : index
    %48 = vector.load %arg2[%c400, %c0_12] : memref<448x32xbf16, #tpu.memory_space<vmem>>, vector<16x32xbf16>
    %49 = vector.extract_strided_slice %46 {offsets = [0, 0], sizes = [2, 16], strides = [1, 1]} : vector<4x16xbf16> to vector<2x16xbf16>
    %cst_13 = arith.constant dense<0.000000e+00> : vector<2x32xf32>
    %50 = tpu.matmul %49, %47, %cst_13 {dimension_numbers = #tpu.dot_dimension_numbers<[1], [0], [0], [1], [0, 0, 1, 1], [], []>} : vector<2x16xbf16>, vector<16x32xbf16>, vector<2x32xf32> -> vector<2x32xf32>
    %51 = vector.extract_strided_slice %46 {offsets = [2, 0], sizes = [2, 16], strides = [1, 1]} : vector<4x16xbf16> to vector<2x16xbf16>
    %cst_14 = arith.constant dense<0.000000e+00> : vector<2x32xf32>
    %52 = tpu.matmul %51, %48, %cst_14 {dimension_numbers = #tpu.dot_dimension_numbers<[1], [0], [0], [1], [0, 0, 1, 1], [], []>} : vector<2x16xbf16>, vector<16x32xbf16>, vector<2x32xf32> -> vector<2x32xf32>
    %53 = arith.addf %50, %52 : vector<2x32xf32>
    %c1 = arith.constant 1 : index
    %c0_15 = arith.constant 0 : index
    %54 = vector.load %arg3[%c1, %c0_15] : memref<3x32xf32, #tpu.memory_space<vmem>>, vector<1x32xf32>
    %55 = vector.broadcast %54 : vector<1x32xf32> to vector<2x32xf32>
    %56 = arith.addf %53, %55 : vector<2x32xf32>
    %cst_16 = arith.constant 0.000000e+00 : f32
    %57 = vector.broadcast %cst_16 : f32 to vector<2x32xf32>
    %58 = arith.maximumf %56, %57 : vector<2x32xf32>
    %59 = arith.truncf %58 : vector<2x32xf32> to vector<2x32xbf16>
    %c416 = arith.constant 416 : index
    %c0_17 = arith.constant 0 : index
    %60 = vector.load %arg2[%c416, %c0_17] : memref<448x32xbf16, #tpu.memory_space<vmem>>, vector<32x4xbf16>
    %c2 = arith.constant 2 : index
    %c0_18 = arith.constant 0 : index
    %61 = vector.load %arg3[%c2, %c0_18] : memref<3x32xf32, #tpu.memory_space<vmem>>, vector<1x4xf32>
    %cst_19 = arith.constant dense<0.000000e+00> : vector<2x4xf32>
    %62 = tpu.matmul %59, %60, %cst_19 {dimension_numbers = #tpu.dot_dimension_numbers<[1], [0], [0], [1], [0, 0, 1, 1], [], []>} : vector<2x32xbf16>, vector<32x4xbf16>, vector<2x4xf32> -> vector<2x4xf32>
    %63 = vector.broadcast %61 : vector<1x4xf32> to vector<2x4xf32>
    %64 = arith.addf %62, %63 : vector<2x4xf32>
    %c0_20 = arith.constant 0 : index
    %c0_21 = arith.constant 0 : index
    %65 = vector.load %arg4[%c0_20, %c0_21] : memref<2x4xf32, #tpu.memory_space<vmem>>, vector<2x4xf32>
    tpu.vector_store %arg4[%c0_20, %c0_21], %64 {strides = array<i32>} : memref<2x4xf32, #tpu.memory_space<vmem>>, vector<2x4xf32>,
    return
  }
  func.func @transform_0(%arg0: i32) -> (i32, i32) {
    %c0_i32 = arith.constant 0 : i32
    %c0_i32_0 = arith.constant 0 : i32
    %c0_i32_1 = arith.constant 0 : i32
    return %c0_i32, %c0_i32_0 : i32, i32
  }
  func.func @transform_1(%arg0: i32) -> (i32, i32) {
    %c0_i32 = arith.constant 0 : i32
    %c0_i32_0 = arith.constant 0 : i32
    %c0_i32_1 = arith.constant 0 : i32
    return %c0_i32, %c0_i32_0 : i32, i32
  }
  func.func @transform_2(%arg0: i32) -> (i32, i32) {
    %c0_i32 = arith.constant 0 : i32
    %c0_i32_0 = arith.constant 0 : i32
    %c0_i32_1 = arith.constant 0 : i32
    return %c0_i32, %c0_i32_0 : i32, i32
  }
  func.func @transform_3(%arg0: i32) -> (i32, i32) {
    %c0_i32 = arith.constant 0 : i32
    %c0_i32_0 = arith.constant 0 : i32
    %c0_i32_1 = arith.constant 0 : i32
    return %c0_i32, %c0_i32_0 : i32, i32
  }
}

</mosaic_0001>

<bundles_post_ra>
// kernel: cnn_text_forward.1
= control target key start
LH: loop header
LB: loop body
LE: loop exit
PB: predicated region body
PF: predicated region fallthrough
CT: control target
= control target key end

     0   :  { %v1146_v2 = vmov 0   ;;  %s1389_s0 = inlined_call_operand.vmem [shape: s32[192,1], index: 0, kind: input, shape index: {}]   ;;  %s1390_s1 = inlined_call_operand.vmem [shape: bf16[448,32], index: 1, kind: input, shape index: {}]   ;;  %s1391_s2 = inlined_call_operand.vmem [shape: f32[3,32], index: 2, kind: input, shape index: {}]   ;;  %s1392_s3 = inlined_call_operand.hbm [shape: f32[2,4], index: 3, kind: output, shape index: {}]  }
   0x1   :  { %v26_v0 = vld [vmem:[%s1389_s0 + $0x40] sm:$0xff]  ;;  %1095 = vset.pattern.permute.xlu1 %v1146_v2  ;;  %1094 = vset.pattern.permute.xlu0 %v1146_v2  ;;  %v27_v3 = vld [vmem:[%s1389_s0 + $0x48] sm:$0xff]  ;;  %v28_v5 = vld [vmem:[%s1389_s0 + $0x50] sm:$0xff] }
   0x2   :  { %v18_v1 = vld [vmem:[%s1389_s0] sm:$0xff]  ;;  %67 = vperm.xlu0 %1094, %v26_v0   ;;  %v19_v4 = vld [vmem:[%s1389_s0 + $0x8] sm:$0xff]  ;;  %v29_v6 = vld [vmem:[%s1389_s0 + $0x58] sm:$0xff] }
   0x3   :  { %43 = vperm.xlu1 %1095, %v18_v1   ;;  %v1096_v7 = vld [vmem:[%s1390_s1 + $0x78] sm:$0xff]   ;;  %v20_v8 = vld [vmem:[%s1389_s0 + $0x10] sm:$0xff]  ;;  %v1100_v13 = vld [vmem:[%s1390_s1 + $0x68] sm:$0xff]  }
   0x4   :  { %v1097_v9 = vld [vmem:[%s1390_s1 + $0x38] sm:$0xff]   ;;  %v1098_v10 = vld [vmem:[%s1390_s1 + $0x70] sm:$0xff]   ;;  %985 = vmatprep.subr.bf16.mxu0 %v1096_v7  ;;  %v30_v14 = vld [vmem:[%s1389_s0 + $0x60] sm:$0xff] }
   0x5   :  { %v21_v11 = vld [vmem:[%s1389_s0 + $0x18] sm:$0xff]  ;;  %986 = vmatpush3.bf16.msra.mxu0 %v1097_v9  ;;  %v1099_v12 = vld [vmem:[%s1390_s1 + $0x30] sm:$0xff]   ;;  %v31_v15 = vld [vmem:[%s1389_s0 + $0x68] sm:$0xff] }
   0x6   :  { %70 = vperm.xlu0 %1094, %v27_v3   ;;  %987 = vmatprep.subr.bf16.mxu0 %v1098_v10  ;;  %v1101_v16 = vld [vmem:[%s1390_s1 + $0x28] sm:$0xff]   ;;  %v22_v17 = vld [vmem:[%s1389_s0 + $0x20] sm:$0xff]  ;;  %v1108_v21 = vld [vmem:[%s1390_s1 + $0xb8] sm:$0xff]  }
   0x7   :  { %46 = vperm.xlu1 %1095, %v19_v4   ;;  %v1102_v18 = vld [vmem:[%s1390_s1 + $0x60] sm:$0xff]   ;;  %v23_v19 = vld [vmem:[%s1389_s0 + $0x28] sm:$0xff]  ;;  %v1104_v23 = vld [vmem:[%s1390_s1 + $0x58] sm:$0xff]   ;;  %1044 = vmatprep.subr.bf16.mxu1 %v1108_v21 }
   0x8   :  { %v1103_v20 = vld [vmem:[%s1390_s1 + $0x20] sm:$0xff]   ;;  %v35_v24 = vld [vmem:[%s1389_s0 + $0x88] sm:$0xff]  ;;  %v1111_v25 = vld [vmem:[%s1390_s1 + $0xb0] sm:$0xff]   ;;  %1045 = vmatpush3.bf16.msra.mxu1 %v1108_v21 }
   0x9   :  { %988 = vmatpush3.bf16.msra.mxu0 %v1099_v12  ;;  %v34_v22 = vld [vmem:[%s1389_s0 + $0x80] sm:$0xff]  ;;  %v1105_v26 = vld [vmem:[%s1390_s1 + $0x18] sm:$0xff]   ;;  %v36_v27 = vld [vmem:[%s1389_s0 + $0x90] sm:$0xff]  ;;  %1046 = vmatprep.subr.bf16.mxu1 %v1111_v25 }
   0xa   :  { %73 = vperm.xlu0 %1094, %v28_v5   ;;  %989 = vmatprep.subr.bf16.mxu0 %v1100_v13  ;;  %v37_v28 = vld [vmem:[%s1389_s0 + $0x98] sm:$0xff]  ;;  %v1106_v29 = vld [vmem:[%s1390_s1 + $0x50] sm:$0xff]   ;;  %v1114_v30 = vld [vmem:[%s1390_s1 + $0xa8] sm:$0xff]  }
   0xb   :  { %76 = vperm.xlu1 %1095, %v29_v6   ;;  %v1107_v31 = vld [vmem:[%s1390_s1 + $0x10] sm:$0xff]   ;;  %v1109_v32 = vld [vmem:[%s1390_s1 + $0x48] sm:$0xff]   ;;  %v33_v34 = vld [vmem:[%s1389_s0 + $0x78] sm:$0xff] }
   0xc   :  { %1047 = vmatpush3.bf16.msra.mxu1 %v1111_v25  ;;  %v32_v33 = vld [vmem:[%s1389_s0 + $0x70] sm:$0xff]  ;;  %v1115_v35 = vld [vmem:[%s1390_s1 + $0xa0] sm:$0xff]   ;;  %v1110_v36 = vld [vmem:[%s1390_s1 + $0x8] sm:$0xff]  }
   0xd   :  { %990 = vmatpush3.bf16.msra.mxu0 %v1101_v16  ;;  %1048 = vmatprep.subr.bf16.mxu1 %v1114_v30  ;;  %v1112_v37 = vld [vmem:[%s1390_s1 + $0x40] sm:$0xff]   ;;  %v1116_v38 = vld [vmem:[%s1390_s1 + $0x98] sm:$0xff]  }
   0xe   :  { %49 = vperm.xlu0 %1094, %v20_v8   ;;  %991 = vmatprep.subr.bf16.mxu0 %v1102_v18 }
   0xf   :  { %52 = vperm.xlu1 %1095, %v21_v11  }
  0x10   :  { %1049 = vmatpush3.bf16.msra.mxu1 %v1114_v30 }
  0x11   :  { %992 = vmatpush3.bf16.msra.mxu0 %v1103_v20  ;;  %1050 = vmatprep.subr.bf16.mxu1 %v1115_v35 }
  0x12   :  { %79 = vperm.xlu0 %1094, %v30_v14   ;;  %993 = vmatprep.subr.bf16.mxu0 %v1104_v23 }
  0x13   :  { %82 = vperm.xlu1 %1095, %v31_v15  }
  0x15   :  { %994 = vmatpush3.bf16.msra.mxu0 %v1105_v26 }
  0x16   :  { %55 = vperm.xlu0 %1094, %v22_v17   ;;  %995 = vmatprep.subr.bf16.mxu0 %v1106_v29 }
  0x17   :  { %58 = vperm.xlu1 %1095, %v23_v19  }
  0x19   :  { %996 = vmatpush3.bf16.msra.mxu0 %v1107_v31 }
  0x1a   :  { %91 = vperm.xlu0 %1094, %v34_v22   ;;  %997 = vmatprep.subr.bf16.mxu0 %v1109_v32 }
  0x1b   :  { %94 = vperm.xlu1 %1095, %v35_v24  }
  0x1e   :  { %97 = vperm.xlu0 %1094, %v36_v27  }
  0x1f   :  { %100 = vperm.xlu1 %1095, %v37_v28  }
  0x22   :  { %85 = vperm.xlu0 %1094, %v32_v33  }
  0x23   :  { %88 = vperm.xlu1 %1095, %v33_v34  }
  0x24   :  { %8 = vsyncpa [#allocation3], 0  ;;  %v24_v39 = vld [vmem:[%s1389_s0 + $0x30] sm:$0xff]  ;;  %v25_v40 = vld [vmem:[%s1389_s0 + $0x38] sm:$0xff]  ;;  %998 = vmatpush3.bf16.msra.mxu0 %v1110_v36  ;;  %1051 = vmatpush3.bf16.msra.mxu1 %v1115_v35  ;;  %v16_v49 = vlaneseq  ;;  %v1147_v55 = vmov 1.0|1.0  }
  0x25   :  { %v1113_v41 = vld [vmem:[%s1390_s1] sm:$0xff]   ;;  %999 = vmatprep.subr.bf16.mxu0 %v1112_v37  ;;  %1052 = vmatprep.subr.bf16.mxu1 %v1116_v38  ;;  %v1117_v42 = vld [vmem:[%s1390_s1 + $0x90] sm:$0xff]   ;;  %v39_v44 = vld [vmem:[%s1389_s0 + $0xa8] sm:$0xff]  ;;  %v1148_v13 = vmov 0.0   ;;  %v1150_v30 = vmov 13   ;;  %s1151_s12 = smov [#allocation2]  }
  0x26   :  { %61 = vperm.xlu0 %1094, %v24_v39   ;;  %v38_v43 = vld [vmem:[%s1389_s0 + $0xa0] sm:$0xff]  ;;  %v1118_v45 = vld [vmem:[%s1390_s1 + $0x88] sm:$0xff]   ;;  %v40_v46 = vld [vmem:[%s1389_s0 + $0xb0] sm:$0xff]  ;;  %v1317_v52 = vand.u32 127, %v16_v49  ;;  %v521_v23 = vshrl.u32 %v16_v49, 7  ;;  %s895_s13 = sshll.u32 %s1151_s12, 4  ;;  %s896_s13 = int_to_ptr.vmem [resolvable:$true] %s895_s13 }
  0x27   :  { %64 = vperm.xlu1 %1095, %v25_v40   ;;  %v41_v47 = vld [vmem:[%s1389_s0 + $0xb8] sm:$0xff]  ;;  %v1119_v48 = vld [vmem:[%s1390_s1 + $0x80] sm:$0xff]   ;;  %v1120_v12 = vld [vmem:[%s1390_s1 + $0xc8] sm:$0xff]   ;;  %s1124_s14 = scalar_lea.vmem %s896_s13, 32  ;;  %p1129_p1 = scmp.lt.s32.totalorder %s896_s13, %s896_s13 }
  0x28   :  { %1000 = vmatpush3.bf16.msra.mxu0 %v1113_v41  ;;  %1053 = vmatpush3.bf16.msra.mxu1 %v1116_v38  ;;  %v1122_v14 = vld [vmem:[%s1390_s1 + $0xd8] sm:$0xff]   ;;  %v524_v25 = vadd.s32 24, %v521_v23  ;;  %v522_v27 = vadd.s32 8, %v521_v23  ;;  %p1125_p0 = scmp.ne.s32.totalorder %s896_s13, %s1124_s14  ;;  %p1130_p2 = scmp.lt.s32.totalorder %s1124_s14, %s1124_s14 }
  0x29   :  { %1054 = vmatprep.subr.bf16.mxu1 %v1117_v42  ;;  %1080 = vmatprep.subr.bf16.mxu0 %v1148_v13 }
  0x2a   :  { %103 = vperm.xlu0 %1094, %v38_v43   ;;  %v554_v29 = vand.u32 15, %v524_v25  ;;  %v540_v35 = vand.u32 15, %v522_v27  ;;  %p1131_p3 = por %p1130_p2, %p1129_p1 }
  0x2b   :  { %106 = vperm.xlu1 %1095, %v39_v44  }
  0x2c   :  { %1055 = vmatpush3.bf16.msra.mxu1 %v1117_v42  ;;  %p1132_p4 = pnand %p1131_p3, %p1125_p0 }
  0x2d   :  { %1056 = vmatprep.subr.bf16.mxu1 %v1118_v45 }
  0x2e   :  { %109 = vperm.xlu0 %1094, %v40_v46  }
  0x2f   :  { %112 = vperm.xlu1 %1095, %v41_v47  }
  0x30   :  { %1057 = vmatpush3.bf16.msra.mxu1 %v1118_v45 }
  0x31   :  { %1058 = vmatprep.subr.bf16.mxu1 %v1119_v48 }
  0x34   :  { %1059 = vmatpush3.bf16.msra.mxu1 %v1119_v48 }
  0x35   :  { %1068 = vmatprep.subr.bf16.mxu1 %v1148_v13 }
  0x7d   :  { %v68_v50 = vpop.permute.xlu0 %67 }
  0x7e   :  { %v44_v51 = vpop.permute.xlu1 %43  ;;  %vm122_vm3 = vcmp.eq.s32.totalorder %v68_v50, %v1317_v52 }
  0x7f   :  { %vm114_vm0 = vcmp.eq.s32.totalorder %v44_v51, %v1317_v52 }
  0x81   :  { %v71_v53 = vpop.permute.xlu0 %70 }
  0x82   :  { %v47_v54 = vpop.permute.xlu1 %46  ;;  %vm123_vm1 = vcmp.eq.s32.totalorder %v71_v53, %v1317_v52 }
  0x83   :  { %vm115_vm2 = vcmp.eq.s32.totalorder %v47_v54, %v1317_v52  ;;  %vm951_vm5 = vmpackc.low %vm123_vm1, %vm122_vm3 }
  0x84   :  { %vm953_vm4 = vmpackc.low %vm115_vm2, %vm114_vm0  ;;  %952 = vmatprep.mubr.msk.bf16.mxu0 %vm951_vm5, %v1147_v55 }
  0x85   :  { %v74_v56 = vpop.permute.xlu0 %73  ;;  %954 = vmatmul.mubr.msk.bf16.vlgmr.msra.gmra.mxu0 %vm953_vm4, %v1147_v55 }
  0x86   :  { %v77_v57 = vpop.permute.xlu1 %76  ;;  %vm124_vm6 = vcmp.eq.s32.totalorder %v74_v56, %v1317_v52  ;;  %1081 = vmatpush3.bf16.msra.mxu0 %v1122_v14 }
  0x87   :  { %vm125_vm7 = vcmp.eq.s32.totalorder %v77_v57, %v1317_v52  ;;  %1082 = vmatprep.subr.bf16.mxu0 %v1148_v13 }
  0x88   :  { %vm955_vm8 = vmpackc.low %vm125_vm7, %vm124_vm6 }
  0x89   :  { %956 = vmatprep.mubr.msk.bf16.mxu0 %vm955_vm8, %v1147_v55  ;;  %v50_v58 = vpop.permute.xlu0 %49 }
  0x8a   :  { %v53_v59 = vpop.permute.xlu1 %52  ;;  %vm116_vm9 = vcmp.eq.s32.totalorder %v50_v58, %v1317_v52  ;;  %v528_v58 = vadd.s32 56, %v521_v23 }
  0x8b   :  { %vm117_vm10 = vcmp.eq.s32.totalorder %v53_v59, %v1317_v52  ;;  %v526_v59 = vadd.s32 40, %v521_v23 }
  0x8c   :  { %vm957_vm11 = vmpackc.low %vm117_vm10, %vm116_vm9 }
  0x8d   :  { %v80_v60 = vpop.permute.xlu0 %79  ;;  %958 = vmatmul.mubr.msk.bf16.gmra.mxu0 %vm957_vm11, %v1147_v55 }
  0x8e   :  { %v83_v61 = vpop.permute.xlu1 %82  ;;  %vm126_vm12 = vcmp.eq.s32.totalorder %v80_v60, %v1317_v52 }
  0x8f   :  { %vm127_vm13 = vcmp.eq.s32.totalorder %v83_v61, %v1317_v52 }
  0x90   :  { %vm959_vm14 = vmpackc.low %vm127_vm13, %vm126_vm12 }
  0x91   :  { %960 = vmatprep.mubr.msk.bf16.mxu0 %vm959_vm14, %v1147_v55  ;;  %v56_v62 = vpop.permute.xlu0 %55 }
  0x92   :  { %v59_v63 = vpop.permute.xlu1 %58  ;;  %vm118_vm15 = vcmp.eq.s32.totalorder %v56_v62, %v1317_v52 }
  0x93   :  { %vm119_vm0 = vcmp.eq.s32.totalorder %v59_v63, %v1317_v52 }
  0x94   :  { %vm961_vm1 = vmpackc.low %vm119_vm0, %vm118_vm15 }
  0x95   :  { %v92_v0 = vpop.permute.xlu0 %91  ;;  %962 = vmatmul.mubr.msk.bf16.gmra.mxu0 %vm961_vm1, %v1147_v55 }
  0x96   :  { %v95_v1 = vpop.permute.xlu1 %94  ;;  %vm130_vm2 = vcmp.eq.s32.totalorder %v92_v0, %v1317_v52  ;;  %v582_v0 = vand.u32 15, %v528_v58 }
  0x97   :  { %vm131_vm3 = vcmp.eq.s32.totalorder %v95_v1, %v1317_v52 }
  0x98   :  { %vm967_vm4 = vmpackc.low %vm131_vm3, %vm130_vm2 }
  0x99   :  { %1060 = vmatprep.mubr.msk.bf16.mxu1 %vm967_vm4, %v1147_v55  ;;  %v98_v2 = vpop.permute.xlu0 %97  ;;  %vm1149_vm4 = vmmov 0  }
  0x9a   :  { %v101_v3 = vpop.permute.xlu1 %100  ;;  %vm132_vm5 = vcmp.eq.s32.totalorder %v98_v2, %v1317_v52 }
  0x9b   :  { %vm133_vm6 = vcmp.eq.s32.totalorder %v101_v3, %v1317_v52  ;;  %v568_v3 = vand.u32 15, %v526_v59 }
  0x9c   :  { %vm969_vm7 = vmpackc.low %vm133_vm6, %vm132_vm5  ;;  %vm625_vm5 = vcmp.lt.s32.totalorder %v1317_v52, 8 }
  0x9d   :  { %1061 = vmatmul.mubr.msk.bf16.vlgmr.msra.gmra.mxu1 %vm969_vm7, %v1147_v55  ;;  %v86_v4 = vpop.permute.xlu0 %85  ;;  %v626_v31 = vsel %vm625_vm5, 14, %v1150_v30  ;;  %vm643_vm7 = vcmask 130048  }
  0x9e   :  { %v89_v5 = vpop.permute.xlu1 %88  ;;  %vm128_vm8 = vcmp.eq.s32.totalorder %v86_v4, %v1317_v52  ;;  %1069 = vmatpush3.bf16.msra.mxu1 %v1120_v12  ;;  %vm630_vm6 = vcmp.le.s32.totalorder %v554_v29, %v626_v31 }
  0x9f   :  { %vm129_vm9 = vcmp.eq.s32.totalorder %v89_v5, %v1317_v52  ;;  %1074 = vmatprep.subr.bf16.mxu1 %v1148_v13 }
  0xa0   :  { %vm963_vm10 = vmpackc.low %vm129_vm9, %vm128_vm8  ;;  %vm628_vm8 = vcmp.le.s32.totalorder %v540_v35, %v626_v31  ;;  %vm634_vm9 = vcmp.le.s32.totalorder %v582_v0, %v626_v31  ;;  %v975_v35 = vld [vmem:[%s1391_s2] ss:$0 sm:$0xff] }
  0xa1   :  { %964 = vmatprep.mubr.msk.bf16.mxu0 %vm963_vm10, %v1147_v55  ;;  %v62_v6 = vpop.permute.xlu0 %61  ;;  %vm632_vm10 = vcmp.le.s32.totalorder %v568_v3, %v626_v31  ;;  %v1123_v3 = vld [vmem:[%s1390_s1 + $0xd0] sm:$0xff]  }
  0xa2   :  { %v65_v7 = vpop.permute.xlu1 %64  ;;  %vm120_vm11 = vcmp.eq.s32.totalorder %v62_v6, %v1317_v52  ;;  %1083 = vmatpush3.bf16.msra.mxu0 %v1123_v3 }
  0xa3   :  { %vm121_vm12 = vcmp.eq.s32.totalorder %v65_v7, %v1317_v52 }
  0xa4   :  { %vm965_vm13 = vmpackc.low %vm121_vm12, %vm120_vm11  ;;  %vm706_vm11 = vcmask 1041409   ;;  %vm843_vm12 = vcmask 261120  }
  0xa5   :  { %966 = vmatmul.mubr.msk.bf16.gmra.mxu0 %vm965_vm13, %v1147_v55  ;;  %v104_v8 = vpop.permute.xlu0 %103  ;;  %vm887_vm13 = vcmask 25600  }
  0xa6   :  { %v107_v9 = vpop.permute.xlu1 %106  ;;  %vm134_vm14 = vcmp.eq.s32.totalorder %v104_v8, %v1317_v52  ;;  %1084 = vmatprep.mubr.msk.bf16.mxu0 %vm1149_vm4, %v1148_v13 }
  0xa7   :  { %vm135_vm15 = vcmp.eq.s32.totalorder %v107_v9, %v1317_v52 }
  0xa8   :  { %vm971_vm0 = vmpackc.low %vm135_vm15, %vm134_vm14 }
  0xa9   :  { %1064 = vmatprep.mubr.msk.bf16.mxu1 %vm971_vm0, %v1147_v55  ;;  %v110_v10 = vpop.permute.xlu0 %109 }
  0xaa   :  { %v113_v11 = vpop.permute.xlu1 %112  ;;  %vm136_vm1 = vcmp.eq.s32.totalorder %v110_v10, %v1317_v52 }
  0xab   :  { %vm137_vm2 = vcmp.eq.s32.totalorder %v113_v11, %v1317_v52 }
  0xac   :  { %vm973_vm3 = vmpackc.low %vm137_vm2, %vm136_vm1 }
  0xad   :  { %1065 = vmatmul.mubr.msk.bf16.gmra.mxu1 %vm973_vm3, %v1147_v55 }
  0xae   :  { %1070 = vmatprep.mubr.msk.bf16.mxu1 %vm1149_vm4, %v1148_v13 }
 0x145   :  { %v1001_v15 = vpop.f32.mrf.mxu0 }
 0x147   :  { %v1002_v16 = vpop.f32.mrf.mxu0 }
 0x148   :  { %v1003_v37 = vadd.f32 %v1002_v16, %v1001_v15 }
 0x149   :  { %v1004_v17 = vpop.f32.mrf.mxu0 }
 0x14b   :  { %v1005_v18 = vpop.f32.mrf.mxu0 }
 0x14c   :  { %v1006_v40 = vadd.f32 %v1005_v18, %v1004_v17 }
 0x14d   :  { %v1007_v19 = vpop.f32.mrf.mxu0 }
 0x14f   :  { %v1008_v20 = vpop.f32.mrf.mxu0 }
 0x150   :  { %v1009_v32 = vadd.f32 %v1008_v20, %v1007_v19 }
 0x151   :  { %v1010_v21 = vpop.f32.mrf.mxu0 }
 0x153   :  { %v1011_v22 = vpop.f32.mrf.mxu0 }
 0x154   :  { %v1012_v36 = vadd.f32 %v1011_v22, %v1010_v21 }
 0x155   :  { %v1013_v24 = vpop.f32.mrf.mxu0 }
 0x157   :  { %v1014_v26 = vpop.f32.mrf.mxu0 }
 0x158   :  { %v1015_v7 = vadd.f32 %v1014_v26, %v1013_v24 }
 0x159   :  { %v1016_v33 = vpop.f32.mrf.mxu0 }
 0x15b   :  { %v1017_v42 = vpop.f32.mrf.mxu0 }
 0x15c   :  { %v1018_v10 = vadd.f32 %v1017_v42, %v1016_v33 }
 0x15d   :  { %v1062_v28 = vpop.f32.mrf.mxu1 }
 0x15e   :  { %v498_v38 = vadd.f32 %v1062_v28, %v1009_v32 }
 0x15f   :  { %v489_v34 = vpop.f32.mrf.mxu1 }
 0x160   :  { %v490_v43 = vadd.f32 %v1003_v37, %v489_v34  ;;  %v653_v47 = vsel %vm643_vm7, %v498_v38, -inf }
 0x161   :  { %v1063_v39 = vpop.f32.mrf.mxu1 }
 0x162   :  { %v501_v41 = vadd.f32 %v1063_v39, %v1012_v36  ;;  %v644_v52 = vsel %vm643_vm7, %v490_v43, -inf }
 0x163   :  { %v492_v44 = vpop.f32.mrf.mxu1 }
 0x164   :  { %v638_v45 = vsel %vm630_vm6, %v501_v41, -inf  ;;  %v493_v46 = vadd.f32 %v1006_v40, %v492_v44 }
 0x165   :  { %v654_v48 = vsel %vm643_vm7, %v638_v45, -inf  ;;  %v1019_v49 = vpop.f32.mrf.mxu0 }
 0x166   :  { %v655_v50 = vmax.f32 %v653_v47, %v654_v48  ;;  %v636_v51 = vsel %vm628_vm8, %v493_v46, -inf }
 0x167   :  { %v645_v53 = vsel %vm643_vm7, %v636_v51, -inf  ;;  %v1020_v54 = vpop.f32.mrf.mxu0 }
 0x168   :  { %v656_v55 = vrot.slane %v655_v50, 4  ;;  %v646_v56 = vmax.f32 %v644_v52, %v645_v53  ;;  %v1021_v1 = vadd.f32 %v1020_v54, %v1019_v49 }
 0x169   :  { %v1022_v57 = vpop.f32.mrf.mxu0 }
 0x16a   :  { %v657_v60 = vmax.f32 %v655_v50, %v656_v55  ;;  %v647_v61 = vrot.slane %v646_v56, 4 }
 0x16b   :  { %v1023_v62 = vpop.f32.mrf.mxu0 }
 0x16c   :  { %v658_v4 = vrot.slane %v657_v60, 2  ;;  %v648_v5 = vmax.f32 %v646_v56, %v647_v61  ;;  %v1024_v6 = vadd.f32 %v1023_v62, %v1022_v57  ;;  %v1121_v61 = vld [vmem:[%s1390_s1 + $0xc0] sm:$0xff]  }
 0x16d   :  { %v1066_v63 = vpop.f32.mrf.mxu1 }
 0x16e   :  { %v514_v8 = vadd.f32 %v1066_v63, %v1021_v1  ;;  %v659_v15 = vmax.f32 %v657_v60, %v658_v4  ;;  %v649_v16 = vrot.slane %v648_v5, 2 }
 0x16f   :  { %v505_v2 = vpop.f32.mrf.mxu1 }
 0x170   :  { %v506_v12 = vadd.f32 %v1015_v7, %v505_v2  ;;  %v671_v19 = vsel %vm643_vm7, %v514_v8, -inf  ;;  %v660_v25 = vrot.slane %v659_v15, 1  ;;  %v650_v26 = vmax.f32 %v648_v5, %v649_v16 }
 0x171   :  { %v1067_v9 = vpop.f32.mrf.mxu1 }
 0x172   :  { %v517_v11 = vadd.f32 %v1067_v9, %v1024_v6  ;;  %v662_v23 = vsel %vm643_vm7, %v506_v12, -inf  ;;  %v661_v31 = vmax.f32 %v659_v15, %v660_v25  ;;  %v651_v32 = vrot.slane %v650_v26, 1  ;;  %v980_v9 = vld [vmem:[%s1391_s2 + $0x1] ss:$0 sm:$0xff] }
 0x173   :  { %v508_v14 = vpop.f32.mrf.mxu1 }
 0x174   :  { %v642_v17 = vsel %vm634_vm9, %v517_v11, -inf  ;;  %v509_v18 = vadd.f32 %v1018_v10, %v508_v14  ;;  %v686_v38 = vadd.f32 %v975_v35, %v661_v31  ;;  %v652_v39 = vmax.f32 %v650_v26, %v651_v32 }
 0x175   :  { %v672_v20 = vsel %vm643_vm7, %v642_v17, -inf  ;;  %v981_v17 = vld [vmem:[%s1391_s2 + $0x2] ss:$0 sm:$0xff] }
 0x176   :  { %v673_v21 = vmax.f32 %v671_v19, %v672_v20  ;;  %v640_v22 = vsel %vm632_vm10, %v509_v18, -inf  ;;  %v690_v44 = vmax.f32 %v686_v38, 0.0  ;;  %v685_v45 = vadd.f32 %v975_v35, %v652_v39 }
 0x177   :  { %v663_v24 = vsel %vm643_vm7, %v640_v22, -inf }
 0x178   :  { %v674_v27 = vrot.slane %v673_v21, 4  ;;  %v664_v28 = vmax.f32 %v662_v23, %v663_v24  ;;  %v694_v50 = vpack.c.bf16 %v690_v44, %v690_v44  ;;  %v689_v51 = vmax.f32 %v685_v45, 0.0 }
 0x17a   :  { %v675_v29 = vmax.f32 %v673_v21, %v674_v27  ;;  %v665_v30 = vrot.slane %v664_v28, 4  ;;  %v761_v56 = vunpack.c.l.b16 %v694_v50  ;;  %v693_v57 = vpack.c.bf16 %v689_v51, %v689_v51 }
 0x17c   :  { %v676_v33 = vrot.slane %v675_v29, 2  ;;  %v666_v34 = vmax.f32 %v664_v28, %v665_v30  ;;  %v762_v63 = vrot.slane %v761_v56, 7  ;;  %v760_v0 = vunpack.c.l.b16 %v693_v57 }
 0x17e   :  { %v677_v36 = vmax.f32 %v675_v29, %v676_v33  ;;  %v667_v37 = vrot.slane %v666_v34, 2  ;;  %v763_v1 = vsel %vm706_vm11, %v762_v63, %v760_v0 }
 0x17f   :  { %v764_v2 = vpack.c.b16 %v763_v1, %v763_v1 }
 0x180   :  { %v678_v40 = vrot.slane %v677_v36, 1  ;;  %v668_v41 = vmax.f32 %v666_v34, %v667_v37 }
 0x182   :  { %v679_v42 = vmax.f32 %v677_v36, %v678_v40  ;;  %v669_v43 = vrot.slane %v668_v41, 1 }
 0x184   :  { %v688_v46 = vadd.f32 %v975_v35, %v679_v42  ;;  %v670_v47 = vmax.f32 %v668_v41, %v669_v43 }
 0x186   :  { %v692_v48 = vmax.f32 %v688_v46, 0.0  ;;  %v687_v49 = vadd.f32 %v975_v35, %v670_v47 }
 0x188   :  { %v696_v52 = vpack.c.bf16 %v692_v48, %v692_v48  ;;  %v691_v53 = vmax.f32 %v687_v49, 0.0 }
 0x18a   :  { %v704_v54 = vunpack.c.l.b16 %v696_v52  ;;  %v695_v55 = vpack.c.bf16 %v691_v53, %v691_v53 }
 0x18c   :  { %v705_v58 = vrot.slane %v704_v54, 7  ;;  %v703_v59 = vunpack.c.l.b16 %v695_v55 }
 0x18e   :  { %v707_v60 = vsel %vm706_vm11, %v705_v58, %v703_v59 }
 0x18f   :  { %v708_v62 = vpack.c.b16 %v707_v60, %v707_v60 }
 0x191   :  { %1071 = vmatmul.mubr.msk.bf16.vlgmr.msra.gmra.mxu1 %vm643_vm7, %v708_v62 }
 0x192   :  { %1075 = vmatpush3.bf16.msra.mxu1 %v1121_v61  ;;  %1076 = vmatprep.mubr.msk.bf16.mxu1 %vm1149_vm4, %v1148_v13 }
 0x199   :  { %1077 = vmatmul.mubr.msk.bf16.vlgmr.msra.gmra.mxu1 %vm643_vm7, %v764_v2 }
 0x251   :  { %v752_v4 = vpop.f32.mrf.mxu1 }
 0x253   :  { %v1072_v5 = vpop.f32.mrf.mxu1 }
 0x255   :  { %v755_v6 = vpop.f32.mrf.mxu1 }
 0x257   :  { %v1073_v7 = vpop.f32.mrf.mxu1 }
 0x259   :  { %v808_v8 = vpop.f32.mrf.mxu1 }
 0x25a   :  { %v809_v10 = vadd.f32 %v808_v8, %v752_v4 }
 0x25b   :  { %v1078_v13 = vpop.f32.mrf.mxu1 }
 0x25c   :  { %v819_v11 = vadd.f32 %v980_v9, %v809_v10 }
 0x25d   :  { %v811_v12 = vpop.f32.mrf.mxu1 }
 0x25e   :  { %v820_v14 = vmax.f32 %v819_v11, 0.0 }
 0x25f   :  { %v1079_v15 = vpop.f32.mrf.mxu1 }
 0x260   :  { %v821_v16 = vpack.c.bf16 %v820_v14, %v820_v14 }
 0x262   :  { %1085 = vmatmul.mubr.msk.bf16.vlgmr.msra.gmra.mxu0 %vm843_vm12, %v821_v16 }
 0x322   :  { %v881_v18 = vpop.f32.mrf.mxu0 }
 0x323   :  { %v882_v19 = vadd.f32 %v981_v17, %v881_v18 }
 0x324   :  { %v1086_v20 = vpop.f32.mrf.mxu0 }
 0x325   :  { %888 = vst.msk [vmem:[#allocation2] sm:$0x3] %vm887_vm13, %v882_v19 }
 0x326   :  { %v884_v21 = vpop.f32.mrf.mxu0 }
 0x327   :  { %1135 = shalt.err (!%p1132_p4)
}
 0x328   :  { %898 = dma.vmem_to_hbm [thread:$0]  %s896_s13, 32, %s1392_s3, [#allocation3]   ;;  %v1087_v22 = vpop.f32.mrf.mxu0 }
 0x329   :  { %1144 = dma.done.wait [#allocation3], 32  }
 0x32a   :  { %1145 = vsyncadd [#allocation3], 4294967264 }
 0x32b   :  { %902 = vsyncpa [#allocation3], 1 }

</bundles_post_ra>
